<compile_context>
chip_gen: v6e
topology: v6e:2x2x1
jax: 0.10.0
libtpu: 0.0.40
codegen_flags: <defaults>
</compile_context>

<pallas_src>
import functools

import jax
import jax.numpy as jnp
from jax.experimental import pallas as pl
from jax.experimental.pallas import tpu as pltpu


def _adain_kernel(x_ref, w_ref, b_ref, o_ref, *, eps):
    # x_ref / o_ref: (tile_rows, HW)   w_ref / b_ref: (tile_rows, 1)
    x = x_ref[...].astype(jnp.float32)

    # Per-row (instance) statistics over the full spatial extent.
    mean = jnp.mean(x, axis=1, keepdims=True)
    var = jnp.mean(jnp.square(x - mean), axis=1, keepdims=True)  # biased var
    inv = jax.lax.rsqrt(var + eps)                               # EUP path

    w = w_ref[...].astype(jnp.float32)
    b = b_ref[...].astype(jnp.float32)

    # Fold per-row:  out = (x - mean) * (inv * w) + b  ==  x * scale + shift
    scale = inv * w
    shift = b - mean * scale
    o_ref[...] = (x * scale + shift).astype(o_ref.dtype)


def _round_up(v, m):
    return (v + m - 1) // m * m


def adaptive_instance_norm_2d(x, weight, bias, eps=1e-5):
    """x: (B, C, H, W), weight/bias: (B*C,). Returns (B, C, H, W)."""
    B, C, H, W = x.shape
    BC, HW = B * C, H * W

    elem = jnp.dtype(x.dtype).itemsize
    # Sub-32-bit dtypes pack along sublanes -> larger row quantum.
    row_quantum = {4: 8, 2: 16, 1: 32}.get(elem, 8)

    # ---- Generation-aware VMEM budget -------------------------------------
    try:
        info = pltpu.get_tpu_info()
        vmem_cap = int(getattr(info, "vmem_capacity_bytes", 64 << 20))
    except Exception:  # non-TPU / lookup failure: conservative default
        vmem_cap = 64 << 20
    # v5e/v6e (128 MiB) -> 100 MiB limit; v7x (64 MiB) -> 48 MiB limit.
    vmem_limit = int(min(max(vmem_cap - (16 << 20), 32 << 20), 100 << 20))

    # Per-step VMEM model (per row of the block):
    #   2x double-buffered input + 2x double-buffered output (input dtype)
    #   + ~2 f32-sized in-kernel temporaries (upcast / centered values).
    bytes_per_row = HW * (2 * elem + 2 * elem + 2 * 4)
    block_budget = (vmem_limit * 3) // 4

    min_rows = min(BC, row_quantum)
    if min_rows * bytes_per_row > block_budget:
        # TODO(synk): for extremely large H*W, split stats/normalize into a
        # two-pass pipeline over a second HW grid axis instead of erroring.
        raise ValueError(
            "adaptive_instance_norm_2d: spatial extent H*W=%d is too large "
            "for a single-pass VMEM tile (budget %d bytes)." % (HW, block_budget))

    # ---- Row-tile selection -------------------------------------------------
    rows_budget = max(row_quantum,
                      (block_budget // bytes_per_row) // row_quantum * row_quantum)

    if BC < row_quantum:
        # Block row dim equals the full array extent (allowed by the tiling rule).
        tile_rows = BC
    else:
        max_rows = (BC // row_quantum) * row_quantum      # keep tile <= BC
        if BC >= 2 * row_quantum:
            # Keep >= 2 grid steps so megacore sharding (v7x) has work for
            # both TensorCores; costs at most one extra ~0.35us step elsewhere.
            half = _round_up(-(-BC // 2), row_quantum)
            max_rows = min(max_rows, half)
        tile_rows = int(min(rows_budget, max_rows))

    grid = (pl.cdiv(BC, tile_rows),)

    # ---- Pallas call (no padding, no post-slice) ---------------------------
    x2d = x.reshape(BC, HW)
    w2d = weight.reshape(BC, 1)
    b2d = bias.reshape(BC, 1)

    kernel = functools.partial(_adain_kernel, eps=float(eps))

    out2d = pl.pallas_call(
        kernel,
        out_shape=jax.ShapeDtypeStruct((BC, HW), x.dtype),
        grid_spec=pltpu.PrefetchScalarGridSpec(
            num_scalar_prefetch=0,
            grid=grid,
            in_specs=[
                # Last dim = full HW extent (lane-dense when HW%128==0,
                # masked otherwise); ragged boundary rows dropped on store.
                pl.BlockSpec((tile_rows, HW), lambda i: (i, 0)),
                pl.BlockSpec((tile_rows, 1), lambda i: (i, 0)),
                pl.BlockSpec((tile_rows, 1), lambda i: (i, 0)),
            ],
            out_specs=pl.BlockSpec((tile_rows, HW), lambda i: (i, 0)),
        ),
        compiler_params=pltpu.CompilerParams(
            dimension_semantics=("parallel",),   # megacore sharding on v7x
            vmem_limit_bytes=vmem_limit,
        ),
    )(x2d, w2d, b2d)

    return out2d.reshape(B, C, H, W)


def _reference(x, weight, bias, eps=1e-5):
    B, C, H, W = x.shape
    x2d = x.reshape(B * C, H * W).astype(jnp.float32)
    mean = jnp.mean(x2d, axis=1, keepdims=True)
    var = jnp.mean((x2d - mean) ** 2, axis=1, keepdims=True)
    out = (x2d - mean) / jnp.sqrt(var + eps)
    out = out * weight[:, None] + bias[:, None]
    return out.reshape(B, C, H, W).astype(x.dtype)


if __name__ == "__main__":
    key = jax.random.PRNGKey(0)
    keys = jax.random.split(key, 9)

    # Primary case (shapes consistent with the module's forward).
    B, C, H, W = 2, 4, 16, 16
    x = jax.random.normal(keys[0], (B, C, H, W), dtype=jnp.float32)
    # weight/bias are assigned externally in AdaIN (e.g. from a style MLP).
    weight = jax.random.normal(keys[1], (B * C,), dtype=jnp.float32) * 0.5 + 1.0
    bias = jax.random.normal(keys[2], (B * C,), dtype=jnp.float32) * 0.1

    out = adaptive_instance_norm_2d(x, weight, bias)
    out = jax.block_until_ready(out)
    ref = _reference(x, weight, bias)
    assert out.shape == (B, C, H, W)
    assert jnp.allclose(out, ref, atol=1e-4, rtol=1e-4)

    # Ragged case: B*C < 8 and H*W not a multiple of 128 (full-extent block,
    # masked stores, no wrapper padding).
    B2, C2, H2, W2 = 1, 3, 5, 7
    x2 = jax.random.normal(keys[3], (B2, C2, H2, W2), dtype=jnp.float32)
    w2 = jax.random.normal(keys[4], (B2 * C2,), dtype=jnp.float32) * 0.5 + 1.0
    b2 = jax.random.normal(keys[5], (B2 * C2,), dtype=jnp.float32) * 0.1

    out2 = adaptive_instance_norm_2d(x2, w2, b2)
    out2 = jax.block_until_ready(out2)
    ref2 = _reference(x2, w2, b2)
    assert out2.shape == (B2, C2, H2, W2)
    assert jnp.allclose(out2, ref2, atol=1e-4, rtol=1e-4)

    # Multi-step grid with a ragged boundary row-tile (B*C = 21, tile_rows = 16):
    # exercises dropped-on-store out-of-range rows and a non-128-multiple H*W.
    B3, C3, H3, W3 = 3, 7, 16, 17
    x3 = jax.random.normal(keys[6], (B3, C3, H3, W3), dtype=jnp.float32)
    w3 = jax.random.normal(keys[7], (B3 * C3,), dtype=jnp.float32) * 0.5 + 1.0
    b3 = jax.random.normal(keys[8], (B3 * C3,), dtype=jnp.float32) * 0.1

    out3 = adaptive_instance_norm_2d(x3, w3, b3)
    out3 = jax.block_until_ready(out3)
    ref3 = _reference(x3, w3, b3)
    assert out3.shape == (B3, C3, H3, W3)
    assert jnp.allclose(out3, ref3, atol=1e-4, rtol=1e-4)

    # TODO(synk): running_mean/running_var momentum EMA updates are a
    # training-time side effect with no influence on the forward output and
    # are not produced by this kernel.
    print("KERNEL_OK")
</pallas_src>

<mosaic_0001>
module attributes {stable_mosaic.version = 11 : i64} {
  func.func @_adain_kernel(%arg0: i32, %arg1: memref<8x256xf32, #tpu.memory_space<vmem>>, %arg2: memref<8x1xf32, #tpu.memory_space<vmem>>, %arg3: memref<8x1xf32, #tpu.memory_space<vmem>>, %arg4: memref<8x256xf32, #tpu.memory_space<vmem>>) attributes {dimension_semantics = [#tpu.dimension_semantics<parallel>], iteration_bounds = array<i64: 1>, scalar_prefetch = 0 : i64, scratch_operands = 0 : i64, tpu.core_type = #tpu.core_type<tc>, window_params = [{transform_indices = @transform_0, window_bounds = array<i64: 8, 256>}, {transform_indices = @transform_1, window_bounds = array<i64: 8, 1>}, {transform_indices = @transform_2, window_bounds = array<i64: 8, 1>}, {transform_indices = @transform_3, window_bounds = array<i64: 8, 256>}]} {
    %c0 = arith.constant 0 : index
    %c0_0 = arith.constant 0 : index
    %0 = vector.load %arg1[%c0, %c0_0] : memref<8x256xf32, #tpu.memory_space<vmem>>, vector<8x256xf32>
    %cst = arith.constant dense<0.000000e+00> : vector<8xf32>
    %1 = vector.multi_reduction <add>, %0, %cst [1] : vector<8x256xf32> to vector<8xf32>
    %2 = vector.shape_cast %1 : vector<8xf32> to vector<8x1xf32>
    %cst_1 = arith.constant 2.560000e+02 : f32
    %3 = vector.broadcast %cst_1 : f32 to vector<8x1xf32>
    %4 = arith.divf %2, %3 : vector<8x1xf32>
    %5 = vector.broadcast %4 : vector<8x1xf32> to vector<8x256xf32>
    %6 = arith.subf %0, %5 : vector<8x256xf32>
    %7 = arith.mulf %6, %6 : vector<8x256xf32>
    %cst_2 = arith.constant dense<0.000000e+00> : vector<8xf32>
    %8 = vector.multi_reduction <add>, %7, %cst_2 [1] : vector<8x256xf32> to vector<8xf32>
    %9 = vector.shape_cast %8 : vector<8xf32> to vector<8x1xf32>
    %cst_3 = arith.constant 2.560000e+02 : f32
    %10 = vector.broadcast %cst_3 : f32 to vector<8x1xf32>
    %11 = arith.divf %9, %10 : vector<8x1xf32>
    %cst_4 = arith.constant 9.99999974E-6 : f32
    %12 = vector.broadcast %cst_4 : f32 to vector<8x1xf32>
    %13 = arith.addf %11, %12 : vector<8x1xf32>
    %14 = math.rsqrt %13 : vector<8x1xf32>
    %c0_5 = arith.constant 0 : index
    %c0_6 = arith.constant 0 : index
    %15 = vector.load %arg2[%c0_5, %c0_6] : memref<8x1xf32, #tpu.memory_space<vmem>>, vector<8x1xf32>
    %c0_7 = arith.constant 0 : index
    %c0_8 = arith.constant 0 : index
    %16 = vector.load %arg3[%c0_7, %c0_8] : memref<8x1xf32, #tpu.memory_space<vmem>>, vector<8x1xf32>
    %17 = arith.mulf %14, %15 : vector<8x1xf32>
    %18 = arith.mulf %4, %17 : vector<8x1xf32>
    %19 = arith.subf %16, %18 : vector<8x1xf32>
    %20 = vector.broadcast %17 : vector<8x1xf32> to vector<8x256xf32>
    %21 = arith.mulf %0, %20 : vector<8x256xf32>
    %22 = vector.broadcast %19 : vector<8x1xf32> to vector<8x256xf32>
    %23 = arith.addf %21, %22 : vector<8x256xf32>
    %c0_9 = arith.constant 0 : index
    %c0_10 = arith.constant 0 : index
    %24 = vector.load %arg4[%c0_9, %c0_10] : memref<8x256xf32, #tpu.memory_space<vmem>>, vector<8x256xf32>
    tpu.vector_store %arg4[%c0_9, %c0_10], %23 {strides = array<i32>} : memref<8x256xf32, #tpu.memory_space<vmem>>, vector<8x256xf32>,
    return
  }
  func.func @transform_0(%arg0: i32) -> (i32, i32) {
    %c0_i32 = arith.constant 0 : i32
    %c0_i32_0 = arith.constant 0 : i32
    return %arg0, %c0_i32 : i32, i32
  }
  func.func @transform_1(%arg0: i32) -> (i32, i32) {
    %c0_i32 = arith.constant 0 : i32
    %c0_i32_0 = arith.constant 0 : i32
    return %arg0, %c0_i32 : i32, i32
  }
  func.func @transform_2(%arg0: i32) -> (i32, i32) {
    %c0_i32 = arith.constant 0 : i32
    %c0_i32_0 = arith.constant 0 : i32
    return %arg0, %c0_i32 : i32, i32
  }
  func.func @transform_3(%arg0: i32) -> (i32, i32) {
    %c0_i32 = arith.constant 0 : i32
    %c0_i32_0 = arith.constant 0 : i32
    return %arg0, %c0_i32 : i32, i32
  }
}

</mosaic_0001>

<bundles_post_ra>
// kernel: tpu_custom_call.1
= control target key start
LH: loop header
LB: loop body
LE: loop exit
PB: predicated region body
PF: predicated region fallthrough
CT: control target
= control target key end

     0   :  { %s132_s0 = inlined_call_operand.vmem [shape: f32[8,256], index: 0, kind: input, shape index: {}]   ;;  %s133_s1 = inlined_call_operand.vmem [shape: f32[8,1], index: 1, kind: input, shape index: {}]   ;;  %s134_s2 = inlined_call_operand.vmem [shape: f32[8,1], index: 2, kind: input, shape index: {}]   ;;  %s135_s3 = inlined_call_operand.hbm [shape: f32[8,256], index: 3, kind: output, shape index: {}]  }
   0x1   :  { %v15_v0 = vld [vmem:[%s132_s0] sm:$0xff]  ;;  %v16_v1 = vld [vmem:[%s132_s0 + $0x8] sm:$0xff] }
   0x2   :  { %8 = vsyncpa [#allocation3], 0  ;;  %v17_v2 = vadd.f32 %v16_v1, %v15_v0  ;;  %v95_v10 = vmov 0   ;;  %v32_v14 = vld [vmem:[%s133_s1] sm:$0xff]  ;;  %s96_s19 = smov [#allocation2]  }
   0x3   :  { %69 = vset.pattern.permute.xlu1 %v95_v10  ;;  %70 = vset.pattern.permute.xlu0 %v95_v10  ;;  %v33_v17 = vld [vmem:[%s134_s2] sm:$0xff]  ;;  %s59_s20 = sshll.u32 %s96_s19, 4  ;;  %s60_s20 = int_to_ptr.vmem [resolvable:$true] %s59_s20 }
   0x4   :  { %18 = vadd.xlane.f32.xlu0 %v17_v2  ;;  %s73_s1 = scalar_lea.vmem %s60_s20, 256  ;;  %p78_p1 = scmp.lt.s32.totalorder %s60_s20, %s60_s20 }
   0x5   :  { %p74_p0 = scmp.ne.s32.totalorder %s60_s20, %s73_s1  ;;  %p79_p2 = scmp.lt.s32.totalorder %s73_s1, %s73_s1 }
   0x7   :  { %p80_p3 = por %p79_p2, %p78_p1 }
   0x9   :  { %p81_p4 = pnand %p80_p3, %p74_p0 }
  0x8d   :  { %v19_v3 = vpop.xlane.xlu0 %18 }
  0x8e   :  { %v21_v4 = vmul.f32 0.00390625, %v19_v3 }
  0x90   :  { %v22_v5 = vsub.f32 %v15_v0, %v21_v4  ;;  %v23_v6 = vsub.f32 %v16_v1, %v21_v4 }
  0x92   :  { %v24_v7 = vmul.f32 %v22_v5, %v22_v5  ;;  %v25_v8 = vmul.f32 %v23_v6, %v23_v6 }
  0x94   :  { %v26_v9 = vadd.f32 %v25_v8, %v24_v7 }
  0x96   :  { %27 = vadd.xlane.f32.xlu0 %v26_v9 }
 0x11f   :  { %v28_v11 = vpop.xlane.xlu0 %27 }
 0x120   :  { %v29_v12 = vmul.f32 0.00390625, %v28_v11 }
 0x122   :  { %v30_v13 = vadd.f32 1e-05, %v29_v12 }
 0x124   :  { %71 = vrsqrt.f32 %v30_v13 }
 0x131   :  { %v72_v15 = vpop.eup %71 }
 0x132   :  { %v34_v16 = vmul.f32 %v72_v15, %v32_v14 }
 0x134   :  { %39 = vperm.xlu1 %69, %v34_v16   ;;  %v35_v18 = vmul.f32 %v34_v16, %v21_v4 }
 0x136   :  { %v36_v19 = vsub.f32 %v33_v17, %v35_v18 }
 0x138   :  { %46 = vperm.xlu1 %69, %v36_v19  }
 0x1af   :  { %v40_v20 = vpop.permute.xlu1 %39 }
 0x1b0   :  { %v42_v21 = vmul.f32 %v40_v20, %v15_v0  ;;  %v43_v22 = vmul.f32 %v40_v20, %v16_v1 }
 0x1b3   :  { %v47_v23 = vpop.permute.xlu1 %46 }
 0x1b4   :  { %v49_v24 = vadd.f32 %v47_v23, %v42_v21  ;;  %v50_v25 = vadd.f32 %v47_v23, %v43_v22 }
 0x1b6   :  { %51 = vst [vmem:[#allocation2] sm:$0xff] %v49_v24  ;;  %52 = vst [vmem:[#allocation2 + $0x8] sm:$0xff] %v50_v25 }
 0x1b7   :  { %84 = shalt.err (!%p81_p4)
}
 0x1b8   :  { %62 = dma.vmem_to_hbm [thread:$0]  %s60_s20, 256, %s135_s3, [#allocation3]  }
 0x1b9   :  { %93 = dma.done.wait [#allocation3], 256  }
 0x1ba   :  { %94 = vsyncadd [#allocation3], 4294967040 }
 0x1bb   :  { %66 = vsyncpa [#allocation3], 1 }

</bundles_post_ra>
